<compile_context>
chip_gen: v7x
topology: tpu7x:2x2x1
jax: 0.10.0
libtpu: 0.0.40
codegen_flags: <defaults>
</compile_context>

<pallas_src>
import functools

import jax
import jax.numpy as jnp
from jax.experimental import pallas as pl
from jax.experimental.pallas import tpu as pltpu


# ---------------------------------------------------------------------------
# Pallas kernel: whole edgewise MLP hot path for one batch tile.
#   x_ref  : [tb, 2H+dim+3]  packed [nf_u | nf_v | sf | deg0 | deg1 | 1]
#   w1_ref : [2H+dim+3+H, dim+2H+2]  packed stage-1 slab (bias row, fea_dot &
#            const columns included)
#   w2_ref : [dim+2H+2, 2]           packed stage-2 slab (b2 folded via const col)
#   out    : [tb, 1]
# ---------------------------------------------------------------------------
def _link_pred_kernel(x_ref, w1_ref, w2_ref, out_ref, *, hidden):
    f32 = jnp.float32
    cdt = x_ref.dtype                      # compute dtype of the MXU operands

    x = x_ref[...]                         # [tb, C]
    # hadamard of the two endpoint feature rows -- kept in f32 (no bf16 VPU on v5e)
    prod = x[:, :hidden].astype(f32) * x[:, hidden:2 * hidden].astype(f32)

    # single fused stage-1 operand: [packed_x | prod]  (K = C + H = 107 <= 128)
    # concat done in f32 (mature lane-concat path), then cast once to the MXU dtype.
    lhs = jnp.concatenate([x.astype(f32), prod], axis=1).astype(cdt)

    # ---- stage 1: [h_l | h_f | d1 | fea_dot | 1] in one MXU pass -----------
    h_pre = jnp.dot(lhs, w1_ref[...], preferred_element_type=f32)   # [tb, N1]
    fea_dot = h_pre[:, -2:-1]              # pre-relu read of the +-dot column
    h = jnp.maximum(h_pre, 0.0)            # relu (const column stays 1)
    # dropout(label/feature): identity in eval mode

    # ---- stage 2: [lin(cat([h_l,h_f])) | lin2_deg(d1)] ----------------------
    z = jnp.dot(h.astype(cdt), w2_ref[...], preferred_element_type=f32)  # [tb, 2]

    out_ref[...] = z[:, 0:1] + fea_dot * z[:, 1:2]


# ---------------------------------------------------------------------------
# Wrapper
# ---------------------------------------------------------------------------
def _pick_tile_b(batch):
    # Big tiles amortize the ~0.35 us per-grid-step overhead, but keep >= 4 grid
    # steps when possible so both v7x TensorCores get >= 2 pipelined steps each.
    # Cap at 2048 so the padded [tb,1] output + intermediates stay comfortably
    # under the 16 MiB v5e default scoped-VMEM budget.
    for t in (2048, 1024, 512, 256, 128, 64, 32, 16, 8):
        if batch >= 4 * t:
            return t
    return min(2048, max(8, ((batch + 7) // 8) * 8))


def pack_inputs(sf, node_features, deg, compute_dtype):
    """One lane-dense stream: [nf_u | nf_v | sf | deg0 | deg1 | 1] -> [B, 2H+dim+3]."""
    B = sf.shape[0]
    nf2 = node_features.reshape(B, -1)                 # free reshape (contiguous)
    ones = jnp.ones((B, 1), sf.dtype)
    return jnp.concatenate([nf2, sf, deg, ones], axis=1).astype(compute_dtype)


def link_predictor_deg_forward(sf, node_features, deg, w1, w2, *, hidden,
                               compute_dtype=jnp.bfloat16, tile_b=None):
    """sf: [B, dim] f32, node_features: [B, 2, H] f32, deg: [B, 2] f32.
    w1/w2: packed slabs from fuse_params (f32; cast to compute_dtype here)."""
    B, dim = sf.shape
    assert node_features.shape == (B, 2, hidden)

    x = pack_inputs(sf, node_features, deg, compute_dtype)    # [B, C]
    C = x.shape[1]
    K1, N1 = w1.shape
    assert K1 == C + hidden and N1 == dim + 2 * hidden + 2

    if tile_b is None:
        tile_b = _pick_tile_b(B)

    # Ragged batches: pad to a tile multiple, slice the result back.
    Bp = ((B + tile_b - 1) // tile_b) * tile_b
    if Bp != B:
        x = jnp.pad(x, ((0, Bp - B), (0, 0)))

    w1c = w1.astype(compute_dtype)
    w2c = w2.astype(compute_dtype)

    grid = (Bp // tile_b,)

    out = pl.pallas_call(
        functools.partial(_link_pred_kernel, hidden=hidden),
        out_shape=jax.ShapeDtypeStruct((Bp, 1), jnp.float32),
        grid_spec=pltpu.PrefetchScalarGridSpec(
            num_scalar_prefetch=0,
            grid=grid,
            in_specs=[
                # single packed activation stream (add pipeline_mode=pl.Buffered(3)
                # here only if profiling shows the input DMA exposed)
                pl.BlockSpec((tile_b, C), lambda i: (i, 0)),
                pl.BlockSpec((K1, N1), lambda i: (0, 0)),
                pl.BlockSpec((N1, 2), lambda i: (0, 0)),
            ],
            out_specs=pl.BlockSpec((tile_b, 1), lambda i: (i, 0)),
        ),
        compiler_params=pltpu.CompilerParams(
            dimension_semantics=("parallel",),
            vmem_limit_bytes=32 * 1024 * 1024,
        ),
    )(x, w1c, w2c)
    return out[:B]


# ---------------------------------------------------------------------------
# Deterministic "PyTorch-like" parameters (eval mode: BN running stats)
# ---------------------------------------------------------------------------
def make_params(key, dim, hidden):
    ks = jax.random.split(key, 20)
    rnd = lambda k, shape, s=0.1: (s * jax.random.normal(k, shape)).astype(jnp.float32)
    return dict(
        # label_lin_layer: Linear(dim, dim), stored transposed [in, out]
        wl=rnd(ks[0], (dim, dim)), bl=rnd(ks[1], (1, dim)),
        bn_l_gamma=1.0 + rnd(ks[2], (1, dim)), bn_l_beta=rnd(ks[3], (1, dim)),
        bn_l_mean=rnd(ks[4], (1, dim)), bn_l_var=jnp.abs(rnd(ks[5], (1, dim))) + 1.0,
        # lin_out: Linear(hidden, hidden)
        wout=rnd(ks[6], (hidden, hidden)), bout=rnd(ks[7], (1, hidden)),
        bn_f_gamma=1.0 + rnd(ks[8], (1, hidden)), bn_f_beta=rnd(ks[9], (1, hidden)),
        bn_f_mean=rnd(ks[10], (1, hidden)), bn_f_var=jnp.abs(rnd(ks[11], (1, hidden))) + 1.0,
        # lin: Linear(dim + hidden, 1)
        wlin=rnd(ks[12], (dim + hidden, 1)), blin=rnd(ks[13], (1, 1)),
        # lin1_deg: Linear(1, hidden); lin2_deg: Linear(hidden, 1)
        w1_deg=rnd(ks[14], (1, hidden)), b1_deg=rnd(ks[15], (1, hidden)),
        w2_deg=rnd(ks[16], (hidden, 1), s=0.05),
        b2_deg=jnp.full((1, 1), 0.01, jnp.float32),
    )


def fuse_params(p, dim, hidden, eps=1e-5):
    """Fold eval-mode BN into the linears and pack everything into two slabs.

    W1 rows (lhs = [nf_u | nf_v | sf | deg0 | deg1 | 1 | prod], K1 = 2H+dim+3+H):
      nf_u / nf_v rows -> 0 ; sf rows -> folded label_lin ; deg rows -> lin1_deg
      (both rows identical => MXU does deg0+deg1) ; ones row -> all biases +
      const column ; prod rows -> folded lin_out + the fea_dot (+1) column.
    W1 cols (N1 = dim+2H+2): [h_l | h_f | d1 | fea_dot | 1].
    W2 [N1, 2]: col0 = lin over cat([h_l,h_f]) (+blin via const row),
                col1 = lin2_deg over d1 (+b2_deg via const row).
    """
    H = hidden
    C = 2 * H + dim + 3
    K1 = C + H
    N1 = dim + 2 * H + 2

    bnl_scale = p["bn_l_gamma"] / jnp.sqrt(p["bn_l_var"] + eps)
    bnl_shift = p["bn_l_beta"] - p["bn_l_mean"] * bnl_scale
    wl_f = p["wl"] * bnl_scale
    bl_f = p["bl"] * bnl_scale + bnl_shift

    bnf_scale = p["bn_f_gamma"] / jnp.sqrt(p["bn_f_var"] + eps)
    bnf_shift = p["bn_f_beta"] - p["bn_f_mean"] * bnf_scale
    wo_f = p["wout"] * bnf_scale
    bo_f = p["bout"] * bnf_scale + bnf_shift

    r_sf, r_deg, r_one, r_prod = 2 * H, 2 * H + dim, 2 * H + dim + 2, C
    c_hl, c_hf, c_d1, c_dot, c_one = 0, dim, dim + H, dim + 2 * H, dim + 2 * H + 1

    w1 = jnp.zeros((K1, N1), jnp.float32)
    w1 = w1.at[r_sf:r_sf + dim, c_hl:c_hl + dim].set(wl_f)
    w1 = w1.at[r_deg, c_d1:c_d1 + H].set(p["w1_deg"][0])
    w1 = w1.at[r_deg + 1, c_d1:c_d1 + H].set(p["w1_deg"][0])
    w1 = w1.at[r_prod:r_prod + H, c_hf:c_hf + H].set(wo_f)
    w1 = w1.at[r_prod:r_prod + H, c_dot].set(1.0)
    w1 = w1.at[r_one, c_hl:c_hl + dim].set(bl_f[0])
    w1 = w1.at[r_one, c_hf:c_hf + H].set(bo_f[0])
    w1 = w1.at[r_one, c_d1:c_d1 + H].set(p["b1_deg"][0])
    w1 = w1.at[r_one, c_one].set(1.0)

    w2 = jnp.zeros((N1, 2), jnp.float32)
    w2 = w2.at[0:dim + H, 0:1].set(p["wlin"])
    w2 = w2.at[c_d1:c_d1 + H, 1:2].set(p["w2_deg"])
    w2 = w2.at[c_one, 0].set(p["blin"][0, 0])
    w2 = w2.at[c_one, 1].set(p["b2_deg"][0, 0])
    return w1, w2


# ---------------------------------------------------------------------------
# Pure-JAX references
# ---------------------------------------------------------------------------
def reference_forward(sf, nf, deg, p, eps=1e-5):
    """Exact (f32, HIGHEST precision) mirror of the PyTorch forward branch."""
    hp = jax.lax.Precision.HIGHEST
    h_l = jnp.dot(sf, p["wl"], precision=hp) + p["bl"]
    h_l = (h_l - p["bn_l_mean"]) / jnp.sqrt(p["bn_l_var"] + eps) * p["bn_l_gamma"] + p["bn_l_beta"]
    h_l = jnp.maximum(h_l, 0.0)
    prod = nf[:, 0, :] * nf[:, 1, :]
    fea_dot = prod.sum(-1, keepdims=True)
    h_f = jnp.dot(prod, p["wout"], precision=hp) + p["bout"]
    h_f = (h_f - p["bn_f_mean"]) / jnp.sqrt(p["bn_f_var"] + eps) * p["bn_f_gamma"] + p["bn_f_beta"]
    h_f = jnp.maximum(h_f, 0.0)
    out1 = jnp.dot(jnp.concatenate([h_l, h_f], 1), p["wlin"], precision=hp) + p["blin"]
    deg_sum = (deg[:, 0] + deg[:, 1])[:, None]
    d1 = jnp.maximum(jnp.dot(deg_sum, p["w1_deg"], precision=hp) + p["b1_deg"], 0.0)
    d2 = jnp.dot(d1, p["w2_deg"], precision=hp) + p["b2_deg"]
    return out1 + fea_dot * d2


def reference_forward_matched(sf, nf, deg, w1, w2, hidden, compute_dtype):
    """Mirrors the kernel's exact quantisation (packed slabs, reduced-precision
    MXU operands, f32 hadamard/accumulate) in plain JAX."""
    f32 = jnp.float32
    x = pack_inputs(sf, nf, deg, compute_dtype)
    prod = x[:, :hidden].astype(f32) * x[:, hidden:2 * hidden].astype(f32)
    lhs = jnp.concatenate([x.astype(f32), prod], axis=1).astype(compute_dtype)
    h_pre = jnp.dot(lhs, w1.astype(compute_dtype), preferred_element_type=f32)
    fea_dot = h_pre[:, -2:-1]
    h = jnp.maximum(h_pre, 0.0)
    z = jnp.dot(h.astype(compute_dtype), w2.astype(compute_dtype),
                preferred_element_type=f32)
    return z[:, 0:1] + fea_dot * z[:, 1:2]


if __name__ == "__main__":
    # args.max_hash_hops = 2 -> dim = 2 * (2 + 2) = 8 ; args.hidden_channels = 32
    MAX_HASH_HOPS = 2
    DIM = MAX_HASH_HOPS * (MAX_HASH_HOPS + 2)   # 8
    HIDDEN = 32
    BATCH = 512   # -> tile_b=128, grid=(4,) "parallel" (>=2 steps per v7x TC)

    key = jax.random.PRNGKey(0)
    k_sf, k_nf, k_deg, k_par = jax.random.split(key, 4)

    sf = jax.random.normal(k_sf, (BATCH, DIM), dtype=jnp.float32)
    node_features = jax.random.normal(k_nf, (BATCH, 2, HIDDEN), dtype=jnp.float32)
    deg = jnp.abs(jax.random.normal(k_deg, (BATCH, 2), dtype=jnp.float32)) * 5.0

    raw_params = make_params(k_par, DIM, HIDDEN)
    w1, w2 = fuse_params(raw_params, DIM, HIDDEN)

    ref = reference_forward(sf, node_features, deg, raw_params)

    # ---- f32 compute path: tight check against the exact PyTorch math -------
    fwd_f32 = jax.jit(functools.partial(
        link_predictor_deg_forward, hidden=HIDDEN, compute_dtype=jnp.float32))
    out_f32 = jax.block_until_ready(fwd_f32(sf, node_features, deg, w1, w2))
    assert out_f32.shape == (BATCH, 1)
    err_f32 = float(jnp.max(jnp.abs(out_f32 - ref)))
    assert jnp.allclose(out_f32, ref, atol=1e-3, rtol=1e-3), \
        f"f32 kernel mismatch vs exact reference (max abs err {err_f32})"

    # ---- bf16 compute path (perf config): check against a precision-matched
    #      reference, plus a loose semantic sanity check vs the exact one ------
    fwd_bf16 = jax.jit(functools.partial(
        link_predictor_deg_forward, hidden=HIDDEN, compute_dtype=jnp.bfloat16))
    out_bf16 = jax.block_until_ready(fwd_bf16(sf, node_features, deg, w1, w2))
    ref_bf16 = reference_forward_matched(sf, node_features, deg, w1, w2,
                                         HIDDEN, jnp.bfloat16)
    err_m = float(jnp.max(jnp.abs(out_bf16 - ref_bf16)))
    assert jnp.allclose(out_bf16, ref_bf16, atol=1e-2, rtol=1e-2), \
        f"bf16 kernel mismatch vs matched reference (max abs err {err_m})"
    assert jnp.allclose(out_bf16, ref, atol=1.0, rtol=0.25), \
        "bf16 kernel grossly deviates from exact reference"

    # TODO(synk): training-mode dropout and BatchNorm batch statistics are not
    # implemented (eval-mode only); other forward() branches (sco_enh != 0,
    # dot_enh == 0, emb is not None) are not implemented.
    print("KERNEL_OK")
</pallas_src>

<mosaic_0001>
module attributes {stable_mosaic.version = 11 : i64} {
  func.func @_link_pred_kernel(%arg0: i32, %arg1: memref<128x75xf32, #tpu.memory_space<vmem>>, %arg2: memref<107x74xf32, #tpu.memory_space<vmem>>, %arg3: memref<74x2xf32, #tpu.memory_space<vmem>>, %arg4: memref<128x1xf32, #tpu.memory_space<vmem>>) attributes {dimension_semantics = [#tpu.dimension_semantics<parallel>], iteration_bounds = array<i64: 4>, scalar_prefetch = 0 : i64, scratch_operands = 0 : i64, tpu.core_type = #tpu.core_type<tc>, window_params = [{transform_indices = @transform_0, window_bounds = array<i64: 128, 75>}, {pipeline_mode = #tpu.pipeline_mode<synchronous>, transform_indices = @transform_1, window_bounds = array<i64: 107, 74>}, {pipeline_mode = #tpu.pipeline_mode<synchronous>, transform_indices = @transform_2, window_bounds = array<i64: 74, 2>}, {transform_indices = @transform_3, window_bounds = array<i64: 128, 1>}]} {
    %c0 = arith.constant 0 : index
    %c0_0 = arith.constant 0 : index
    %0 = vector.load %arg1[%c0, %c0_0] : memref<128x75xf32, #tpu.memory_space<vmem>>, vector<128x75xf32>
    %1 = vector.extract_strided_slice %0 {offsets = [0, 0], sizes = [128, 32], strides = [1, 1]} : vector<128x75xf32> to vector<128x32xf32>
    %2 = vector.extract_strided_slice %0 {offsets = [0, 32], sizes = [128, 32], strides = [1, 1]} : vector<128x75xf32> to vector<128x32xf32>
    %3 = arith.mulf %1, %2 : vector<128x32xf32>
    %4 = tpu.concatenate %0, %3 in 1 : vector<128x75xf32>, vector<128x32xf32> -> vector<128x107xf32>
    %c0_1 = arith.constant 0 : index
    %c0_2 = arith.constant 0 : index
    %5 = vector.load %arg2[%c0_1, %c0_2] : memref<107x74xf32, #tpu.memory_space<vmem>>, vector<107x74xf32>
    %cst = arith.constant dense<0.000000e+00> : vector<128x74xf32>
    %6 = tpu.matmul %4, %5, %cst {dimension_numbers = #tpu.dot_dimension_numbers<[1], [0], [0], [1], [0, 0, 1, 1], [], []>} : vector<128x107xf32>, vector<107x74xf32>, vector<128x74xf32> -> vector<128x74xf32>
    %7 = vector.extract_strided_slice %6 {offsets = [0, 72], sizes = [128, 1], strides = [1, 1]} : vector<128x74xf32> to vector<128x1xf32>
    %cst_3 = arith.constant 0.000000e+00 : f32
    %8 = vector.broadcast %cst_3 : f32 to vector<128x74xf32>
    %9 = arith.maximumf %6, %8 : vector<128x74xf32>
    %c0_4 = arith.constant 0 : index
    %c0_5 = arith.constant 0 : index
    %10 = vector.load %arg3[%c0_4, %c0_5] : memref<74x2xf32, #tpu.memory_space<vmem>>, vector<74x2xf32>
    %cst_6 = arith.constant dense<0.000000e+00> : vector<128x2xf32>
    %11 = tpu.matmul %9, %10, %cst_6 {dimension_numbers = #tpu.dot_dimension_numbers<[1], [0], [0], [1], [0, 0, 1, 1], [], []>} : vector<128x74xf32>, vector<74x2xf32>, vector<128x2xf32> -> vector<128x2xf32>
    %12 = vector.extract_strided_slice %11 {offsets = [0, 0], sizes = [128, 1], strides = [1, 1]} : vector<128x2xf32> to vector<128x1xf32>
    %13 = vector.extract_strided_slice %11 {offsets = [0, 1], sizes = [128, 1], strides = [1, 1]} : vector<128x2xf32> to vector<128x1xf32>
    %14 = arith.mulf %7, %13 : vector<128x1xf32>
    %15 = arith.addf %12, %14 : vector<128x1xf32>
    %c0_7 = arith.constant 0 : index
    %c0_8 = arith.constant 0 : index
    %16 = vector.load %arg4[%c0_7, %c0_8] : memref<128x1xf32, #tpu.memory_space<vmem>>, vector<128x1xf32>
    tpu.vector_store %arg4[%c0_7, %c0_8], %15 {strides = array<i32>} : memref<128x1xf32, #tpu.memory_space<vmem>>, vector<128x1xf32>,
    return
  }
  func.func @transform_0(%arg0: i32) -> (i32, i32) {
    %c0_i32 = arith.constant 0 : i32
    %c0_i32_0 = arith.constant 0 : i32
    return %arg0, %c0_i32 : i32, i32
  }
  func.func @transform_1(%arg0: i32) -> (i32, i32) {
    %c0_i32 = arith.constant 0 : i32
    %c0_i32_0 = arith.constant 0 : i32
    %c0_i32_1 = arith.constant 0 : i32
    return %c0_i32, %c0_i32_0 : i32, i32
  }
  func.func @transform_2(%arg0: i32) -> (i32, i32) {
    %c0_i32 = arith.constant 0 : i32
    %c0_i32_0 = arith.constant 0 : i32
    %c0_i32_1 = arith.constant 0 : i32
    return %c0_i32, %c0_i32_0 : i32, i32
  }
  func.func @transform_3(%arg0: i32) -> (i32, i32) {
    %c0_i32 = arith.constant 0 : i32
    %c0_i32_0 = arith.constant 0 : i32
    return %arg0, %c0_i32 : i32, i32
  }
}

</mosaic_0001>

<bundles_post_ra>
// kernel: link_predictor_deg_forward.1
= control target key start
LH: loop header
LB: loop body
LE: loop exit
PB: predicated region body
PF: predicated region fallthrough
CT: control target
= control target key end

     0   :  { %s1315_s12 = smov 0   ;;  %s1785_s0 = inlined_call_operand.vmem [shape: f32[512,75], index: 0, kind: input, shape index: {}]   ;;  %s1786_s1 = inlined_call_operand.vmem [shape: f32[107,74], index: 1, kind: input, shape index: {}]   ;;  %s1787_s2 = inlined_call_operand.vmem [shape: f32[74,2], index: 2, kind: input, shape index: {}]   ;;  %s1788_s3 = inlined_call_operand.vmem [shape: f32[512,1], index: 3, kind: output, shape index: {}]  }
   0x1 LB: > { %s1020_s13 = sadd.s32 4294967295, %s1288_s12   ;;  %p1024_p0 = scmp.ge.s32.totalorder %s1288_s12, 1  ;;  %s1288_s12 = sphi %s1315_s12, %s13_s12  }
   0x2   : > { %p138_p1 = scmp.lt.s32.totalorder %s1288_s12, 5 }
   0x4   : > { %p139_p2 = pnand %p1024_p0, %p138_p1 }
   0x5   : > { %s1025_s14 = sshll.u32 (!%p139_p2), %s1020_s13, 4  ;;  %s1290_s19 = smov (!%p139_p2), 96   ;;  %v351_v14 = vld [vmem:[%s1786_s1] sm:$0xff] (!%p139_p2)  ;;  %v352_v15 = vld [vmem:[%s1786_s1 + $0x8] sm:$0xff] (!%p139_p2)  ;;  %v353_v16 = vld [vmem:[%s1786_s1 + $0x10] sm:$0xff] (!%p139_p2)  ;;  %vm414_vm0 = vcmask (!%p139_p2), 1042432  }
   0x6   : > { %142 = sbr.rel (%p139_p2) target bundleno = 946 (0x3b2), region = 32  ;;  %p163_p3 = scmp.lt.s32.totalorder (!%p139_p2), %s1025_s14, 63  ;;  %v1217_v17 = vpack.c.bf16 (!%p139_p2), %v352_v15, %v351_v14  ;;  %v354_v18 = vld [vmem:[%s1786_s1 + $0x18] sm:$0xff] (!%p139_p2)  ;;  %v355_v20 = vld [vmem:[%s1786_s1 + $0x20] sm:$0xff] (!%p139_p2)  ;;  %v356_v21 = vld [vmem:[%s1786_s1 + $0x28] sm:$0xff] (!%p139_p2)  ;;  %vm1291_vm1 = vmmov (!%p139_p2), 1  }
   0x7   : > { %v1221_v19 = vpack.c.bf16 (!%p139_p2), %v354_v18, %v353_v16  ;;  %v1225_v24 = vpack.c.bf16 (!%p139_p2), %v356_v21, %v355_v20  ;;  %v357_v25 = vld [vmem:[%s1786_s1 + $0x30] sm:$0xff] (!%p139_p2)  ;;  %v358_v26 = vld [vmem:[%s1786_s1 + $0x38] sm:$0xff] (!%p139_p2)  ;;  %v359_v28 = vld [vmem:[%s1786_s1 + $0x40] sm:$0xff] (!%p139_p2)  ;;  %s1292_s24 = smov (!%p139_p2), 75   ;;  %vm334_vm3 = vcmask (!%p139_p2), 613376   ;;  %vm365_vm4 = vcmask (!%p139_p2), 875520  }
   0x8   : > { %1218 = vmatprep.subr.bf16.mxu0 (!%p139_p2), %v1217_v17  ;;  %v1229_v27 = vpack.c.bf16 (!%p139_p2), %v358_v26, %v357_v25  ;;  %v360_v29 = vld [vmem:[%s1786_s1 + $0x48] sm:$0xff] (!%p139_p2)  ;;  %v361_v31 = vld [vmem:[%s1786_s1 + $0x50] sm:$0xff] (!%p139_p2)  ;;  %v362_v32 = vld [vmem:[%s1786_s1 + $0x58] sm:$0xff] (!%p139_p2)  ;;  %vm638_vm5 = vcmask (!%p139_p2), 1041408   ;;  %vm589_vm7 = vcmask (!%p139_p2), 605184   ;;  %s1293_s21 = smov (!%p139_p2), 71  }
   0x9   : > { %1220 = vmatpush3.bf16.msra.mxu0 (!%p139_p2), %v1217_v17  ;;  %v1233_v30 = vpack.c.bf16 (!%p139_p2), %v360_v29, %v359_v28  ;;  %v1237_v33 = vpack.c.bf16 (!%p139_p2), %v362_v32, %v361_v31  ;;  %v363_v34 = vld [vmem:[%s1786_s1 + $0x60] sm:$0xff] (!%p139_p2)  ;;  %v364_v35 = vld [vmem:[%s1786_s1 + $0x68] sm:$0x7] (!%p139_p2)  ;;  %vm1242_vm2 = vmpackc.low (!%p139_p2), %vm414_vm0, %vm1291_vm1  ;;  %s1294_s22 = smov (!%p139_p2), 56   ;;  %vm947_vm8 = vcmask (!%p139_p2), 7168  }
   0xa   : > { %1222 = vmatprep.subr.bf16.mxu0 (!%p139_p2), %v1221_v19  ;;  %v1241_v36 = vpack.c.bf16 (!%p139_p2), %v364_v35, %v363_v34  ;;  %v579_v61 = vld [vmem:[%s1787_s2] sm:$0xff] (!%p139_p2)  ;;  %v580_v62 = vld [vmem:[%s1787_s2 + $0x8] sm:$0xff] (!%p139_p2)  ;;  %v581_v16 = vld [vmem:[%s1787_s2 + $0x10] sm:$0xff] (!%p139_p2) }
   0xb   : > { %v1247_v15 = vpack.c.bf16 (!%p139_p2), %v580_v62, %v579_v61  ;;  %v582_v17 = vld [vmem:[%s1787_s2 + $0x18] sm:$0xff] (!%p139_p2)  ;;  %v583_v20 = vld [vmem:[%s1787_s2 + $0x20] sm:$0xff] (!%p139_p2)  ;;  %v584_v21 = vld [vmem:[%s1787_s2 + $0x28] sm:$0xff] (!%p139_p2) }
   0xc   : > { %v1255_v28 = vpack.c.bf16 (!%p139_p2), %v584_v21, %v583_v20  ;;  %v585_v29 = vld [vmem:[%s1787_s2 + $0x30] sm:$0xff] (!%p139_p2)  ;;  %vm1264_vm6 = vmpackc.low (!%p139_p2), %vm638_vm5, %vm1291_vm1 }
   0xd   : > { %s1790_s14 = smov (!%p163_p3, %s1025_s14), 63  ;;  %1224 = vmatpush3.bf16.msra.mxu0 %v1221_v19  ;;  %v1251_v19 = vpack.c.bf16 %v582_v17, %v581_v16  ;;  %1248 = vmatprep.subr.bf16.mxu1 %v1247_v15 }
   0xe   : > { %s1026_s15 = sshll.u32 %s1790_s14, 3  ;;  %1226 = vmatprep.subr.bf16.mxu0 %v1225_v24  ;;  %1250 = vmatpush3.bf16.msra.mxu1 %v1247_v15 }
   0xf   : > { %s1331_s18 = scalar_lea.vmem %s1785_s0, %s1026_s15  ;;  %1252 = vmatprep.subr.bf16.mxu1 %v1251_v19  ;;  %s1732_s25 = scalar_lea.vmem %s1788_s3, %s1026_s15 }
  0x10   : > { %v1334_v0 = vld [vmem:[%s1331_s18] sm:$0xff]  ;;  %v1337_v1 = vld [vmem:[%s1331_s18 + $0x10] sm:$0xff]  ;;  %v1344_v2 = vld [vmem:[%s1331_s18 + $0x8] sm:$0xff] }
  0x11   : > { %206 = vrot.lane.b32.xlu0 %v1334_v0, %s1290_s19  ;;  %210 = vrot.lane.b32.xlu1 %v1337_v1, %s1290_s19  ;;  %v1347_v3 = vld [vmem:[%s1331_s18 + $0x18] sm:$0xff]  ;;  %v1354_v4 = vld [vmem:[%s1331_s18 + $0x20] sm:$0xff] }
  0x12   : > { %v1357_v5 = vld [vmem:[%s1331_s18 + $0x28] sm:$0xff]  ;;  %v1364_v6 = vld [vmem:[%s1331_s18 + $0x30] sm:$0xff]  ;;  %v1367_v7 = vld [vmem:[%s1331_s18 + $0x38] sm:$0xff]  ;;  %1228 = vmatpush3.bf16.msra.mxu0 %v1225_v24  ;;  %1254 = vmatpush3.bf16.msra.mxu1 %v1251_v19 }
  0x13   : > { %v1374_v8 = vld [vmem:[%s1331_s18 + $0x40] sm:$0xff]  ;;  %v1377_v9 = vld [vmem:[%s1331_s18 + $0x48] sm:$0xff]  ;;  %v1384_v10 = vld [vmem:[%s1331_s18 + $0x50] sm:$0xff]  ;;  %1230 = vmatprep.subr.bf16.mxu0 %v1229_v27  ;;  %1256 = vmatprep.subr.bf16.mxu1 %v1255_v28 }
  0x14   : > { %v1387_v11 = vld [vmem:[%s1331_s18 + $0x58] sm:$0xff]  ;;  %v1394_v12 = vld [vmem:[%s1331_s18 + $0x60] sm:$0xff]  ;;  %v1397_v13 = vld [vmem:[%s1331_s18 + $0x68] sm:$0xff] }
  0x15   : > { %208 = vrot.lane.b32.xlu0 %v1344_v2, %s1290_s19  ;;  %212 = vrot.lane.b32.xlu1 %v1347_v3, %s1290_s19  ;;  %v1422_v22 = vld [vmem:[%s1331_s18 + $0x70] sm:$0xff]  ;;  %v1425_v23 = vld [vmem:[%s1331_s18 + $0x78] sm:$0xff] }
  0x16   : > { %1232 = vmatpush3.bf16.msra.mxu0 %v1229_v27  ;;  %1258 = vmatpush3.bf16.msra.mxu1 %v1255_v28 }
  0x17   : > { %1234 = vmatprep.subr.bf16.mxu0 %v1233_v30 }
  0x19   : > { %214 = vrot.lane.b32.xlu0 %v1354_v4, %s1290_s19  ;;  %216 = vrot.lane.b32.xlu1 %v1357_v5, %s1290_s19 }
  0x1a   : > { %1236 = vmatpush3.bf16.msra.mxu0 %v1233_v30  ;;  %v586_v30 = vld [vmem:[%s1787_s2 + $0x38] sm:$0xff] }
  0x1b   : > { %1238 = vmatprep.subr.bf16.mxu0 %v1237_v33  ;;  %v1259_v32 = vpack.c.bf16 %v586_v30, %v585_v29 }
  0x1d   : > { %218 = vrot.lane.b32.xlu0 %v1364_v6, %s1290_s19  ;;  %220 = vrot.lane.b32.xlu1 %v1367_v7, %s1290_s19 }
  0x1e   : > { %1240 = vmatpush3.bf16.msra.mxu0 %v1237_v33  ;;  %1260 = vmatprep.subr.bf16.mxu1 %v1259_v32 }
  0x1f   : > { %1243 = vmatprep.subr.msk.bf16.mxu0 %vm1242_vm2, %v1241_v36  ;;  %1262 = vmatpush3.bf16.msra.mxu1 %v1259_v32 }
  0x21   : > { %222 = vrot.lane.b32.xlu0 %v1374_v8, %s1290_s19  ;;  %224 = vrot.lane.b32.xlu1 %v1377_v9, %s1290_s19 }
  0x22   : > { %1246 = vmatpush3.bf16.msk.msra.mxu0 %vm1242_vm2, %v1241_v36 }
  0x25   : > { %226 = vrot.lane.b32.xlu0 %v1384_v10, %s1290_s19  ;;  %228 = vrot.lane.b32.xlu1 %v1387_v11, %s1290_s19 }
  0x29   : > { %230 = vrot.lane.b32.xlu0 %v1394_v12, %s1290_s19  ;;  %232 = vrot.lane.b32.xlu1 %v1397_v13, %s1290_s19 }
  0x2d   : > { %234 = vrot.lane.b32.xlu0 %v1422_v22, %s1290_s19  ;;  %236 = vrot.lane.b32.xlu1 %v1425_v23, %s1290_s19 }
  0x83   : > { %v207_v37 = vpop.permute.xlu0 %206  ;;  %v211_v38 = vpop.permute.xlu1 %210 }
  0x84   : > { %v254_v39 = vmul.f32 %v207_v37, %v1334_v0  ;;  %v256_v40 = vmul.f32 %v211_v38, %v1337_v1 }
  0x86   : > { %286 = vrot.lane.b32.xlu0 %v254_v39, %s1292_s24 }
  0x87   : > { %v209_v41 = vpop.permute.xlu0 %208  ;;  %v213_v42 = vpop.permute.xlu1 %212 }
  0x88   : > { %v255_v43 = vmul.f32 %v209_v41, %v1344_v2  ;;  %v257_v44 = vmul.f32 %v213_v42, %v1347_v3 }
  0x8a   : > { %290 = vrot.lane.b32.xlu0 %v256_v40, %s1292_s24  ;;  %288 = vrot.lane.b32.xlu1 %v255_v43, %s1292_s24 }
  0x8b   : > { %v215_v45 = vpop.permute.xlu0 %214  ;;  %v217_v46 = vpop.permute.xlu1 %216 }
  0x8c   : > { %v258_v47 = vmul.f32 %v215_v45, %v1354_v4  ;;  %v259_v48 = vmul.f32 %v217_v46, %v1357_v5 }
  0x8e   : > { %292 = vrot.lane.b32.xlu1 %v257_v44, %s1292_s24  ;;  %294 = vrot.lane.b32.xlu0 %v258_v47, %s1292_s24 }
  0x8f   : > { %v219_v49 = vpop.permute.xlu0 %218  ;;  %v221_v50 = vpop.permute.xlu1 %220 }
  0x90   : > { %v260_v51 = vmul.f32 %v219_v49, %v1364_v6  ;;  %v261_v52 = vmul.f32 %v221_v50, %v1367_v7 }
  0x92   : > { %296 = vrot.lane.b32.xlu1 %v259_v48, %s1292_s24  ;;  %298 = vrot.lane.b32.xlu0 %v260_v51, %s1292_s24 }
  0x93   : > { %v223_v53 = vpop.permute.xlu0 %222  ;;  %v225_v54 = vpop.permute.xlu1 %224 }
  0x94   : > { %v262_v55 = vmul.f32 %v223_v53, %v1374_v8  ;;  %v263_v56 = vmul.f32 %v225_v54, %v1377_v9 }
  0x96   : > { %300 = vrot.lane.b32.xlu1 %v261_v52, %s1292_s24  ;;  %302 = vrot.lane.b32.xlu0 %v262_v55, %s1292_s24  ;;  %v587_v52 = vld [vmem:[%s1787_s2 + $0x40] sm:$0xff] }
  0x97   : > { %v227_v57 = vpop.permute.xlu0 %226  ;;  %v229_v58 = vpop.permute.xlu1 %228 }
  0x98   : > { %v264_v59 = vmul.f32 %v227_v57, %v1384_v10  ;;  %v265_v60 = vmul.f32 %v229_v58, %v1387_v11 }
  0x9a   : > { %304 = vrot.lane.b32.xlu1 %v263_v56, %s1292_s24  ;;  %306 = vrot.lane.b32.xlu0 %v264_v59, %s1292_s24 }
  0x9b   : > { %v231_v63 = vpop.permute.xlu0 %230  ;;  %v233_v14 = vpop.permute.xlu1 %232 }
  0x9c   : > { %v266_v18 = vmul.f32 %v231_v63, %v1394_v12  ;;  %v267_v24 = vmul.f32 %v233_v14, %v1397_v13 }
  0x9e   : > { %308 = vrot.lane.b32.xlu1 %v265_v60, %s1292_s24  ;;  %310 = vrot.lane.b32.xlu0 %v266_v18, %s1292_s24 }
  0x9f   : > { %v235_v25 = vpop.permute.xlu0 %234  ;;  %v237_v26 = vpop.permute.xlu1 %236 }
  0xa0   : > { %v268_v27 = vmul.f32 %v235_v25, %v1422_v22  ;;  %v269_v31 = vmul.f32 %v237_v26, %v1425_v23 }
  0xa2   : > { %312 = vrot.lane.b32.xlu1 %v267_v24, %s1292_s24  ;;  %314 = vrot.lane.b32.xlu0 %v268_v27, %s1292_s24 }
  0xa6   : > { %316 = vrot.lane.b32.xlu1 %v269_v31, %s1292_s24 }
  0xf8   : > { %v287_v33 = vpop.permute.xlu0 %286 }
  0xf9   : > { %v335_v34 = vsel %vm334_vm3, %v1334_v0, %v287_v33 }
  0xfa   : > { %1149 = vmatprep.mubr.msk.f32.mxu0 %vm365_vm4, %v335_v34 }
  0xfc   : > { %v289_v35 = vpop.permute.xlu1 %288  ;;  %v291_v36 = vpop.permute.xlu0 %290 }
  0xfd   : > { %v336_v37 = vsel %vm334_vm3, %v1344_v2, %v289_v35  ;;  %v337_v38 = vsel %vm334_vm3, %v1337_v1, %v291_v36 }
  0xfe   : > { %1150 = vmatmul.mubr.msk.f32.vlgmr.msra.gmra.mrb[0].mxu0 %vm365_vm4, %v336_v37 }
  0xff   : > { %1152 = vmatprep.mubr.msk.f32.mxu0 %vm365_vm4, %v337_v38 }
 0x100   : > { %v293_v39 = vpop.permute.xlu1 %292  ;;  %v295_v40 = vpop.permute.xlu0 %294 }
 0x101   : > { %v338_v41 = vsel %vm334_vm3, %v1347_v3, %v293_v39  ;;  %v339_v0 = vsel %vm334_vm3, %v1354_v4, %v295_v40 }
 0x102   : > { %1153 = vmatmul.mubr.msk.f32.gmra.mrb[2].mxu0 %vm365_vm4, %v338_v41 }
 0x103   : > { %1155 = vmatprep.mubr.msk.f32.mxu0 %vm365_vm4, %v339_v0 }
 0x104   : > { %v297_v2 = vpop.permute.xlu1 %296  ;;  %v299_v42 = vpop.permute.xlu0 %298 }
 0x105   : > { %v340_v1 = vsel %vm334_vm3, %v1357_v5, %v297_v2  ;;  %v341_v43 = vsel %vm334_vm3, %v1364_v6, %v299_v42 }
 0x106   : > { %1156 = vmatmul.mubr.msk.f32.gmra.mrb[4].mxu0 %vm365_vm4, %v340_v1 }
 0x107   : > { %1158 = vmatprep.mubr.msk.f32.mxu0 %vm365_vm4, %v341_v43 }
 0x108   : > { %v301_v3 = vpop.permute.xlu1 %300  ;;  %v303_v44 = vpop.permute.xlu0 %302 }
 0x109   : > { %v342_v4 = vsel %vm334_vm3, %v1367_v7, %v301_v3  ;;  %v343_v45 = vsel %vm334_vm3, %v1374_v8, %v303_v44 }
 0x10a   : > { %1159 = vmatmul.mubr.msk.f32.gmra.mrb[6].mxu0 %vm365_vm4, %v342_v4 }
 0x10b   : > { %1161 = vmatprep.mubr.msk.f32.mxu0 %vm365_vm4, %v343_v45 }
 0x10c   : > { %v305_v5 = vpop.permute.xlu1 %304  ;;  %v307_v46 = vpop.permute.xlu0 %306 }
 0x10d   : > { %v344_v6 = vsel %vm334_vm3, %v1377_v9, %v305_v5  ;;  %v345_v47 = vsel %vm334_vm3, %v1384_v10, %v307_v46 }
 0x10e   : > { %1162 = vmatmul.mubr.msk.f32.gmra.mrb[8].mxu0 %vm365_vm4, %v344_v6 }
 0x10f   : > { %1164 = vmatprep.mubr.msk.f32.mxu0 %vm365_vm4, %v345_v47 }
 0x110   : > { %v309_v7 = vpop.permute.xlu1 %308  ;;  %v311_v48 = vpop.permute.xlu0 %310 }
 0x111   : > { %v346_v8 = vsel %vm334_vm3, %v1387_v11, %v309_v7  ;;  %v347_v49 = vsel %vm334_vm3, %v1394_v12, %v311_v48 }
 0x112   : > { %1165 = vmatmul.mubr.msk.f32.gmra.mrb[10].mxu0 %vm365_vm4, %v346_v8 }
 0x113   : > { %1167 = vmatprep.mubr.msk.f32.mxu0 %vm365_vm4, %v347_v49 }
 0x114   : > { %v313_v9 = vpop.permute.xlu1 %312  ;;  %v315_v50 = vpop.permute.xlu0 %314 }
 0x115   : > { %v348_v10 = vsel %vm334_vm3, %v1397_v13, %v313_v9  ;;  %v349_v51 = vsel %vm334_vm3, %v1422_v22, %v315_v50  ;;  %v588_v13 = vld [vmem:[%s1787_s2 + $0x48] sm:$0x3] }
 0x116   : > { %1168 = vmatmul.mubr.msk.f32.gmra.mrb[12].mxu0 %vm365_vm4, %v348_v10  ;;  %v1263_v22 = vpack.c.bf16 %v588_v13, %v587_v52 }
 0x117   : > { %1170 = vmatprep.mubr.msk.f32.mxu0 %vm365_vm4, %v349_v51 }
 0x118   : > { %v317_v11 = vpop.permute.xlu1 %316  ;;  %1265 = vmatprep.subr.msk.bf16.mxu1 %vm1264_vm6, %v1263_v22 }
 0x119   : > { %v350_v12 = vsel %vm334_vm3, %v1425_v23, %v317_v11  ;;  %1268 = vmatpush3.bf16.msk.msra.mxu1 %vm1264_vm6, %v1263_v22 }
 0x11a   : > { %1171 = vmatmul.mubr.msk.f32.gmra.mrb[14].mxu0 %vm365_vm4, %v350_v12 }
 0x1d1   : > { %v1567_v53 = vpop.f32.mrb[0].mxu0 }
 0x1d2   : > { %v1569_v54 = vpop.f32.mrb[1].mxu0  ;;  %v564_v55 = vmax.f32 %v1567_v53, 0.0 }
 0x1d3   : > { %v563_v23 = vmax.f32 %v1569_v54, 0.0 }
 0x1d5   : > { %v1573_v56 = vpop.f32.mrb[2].mxu0  ;;  %1193 = vmatprep.mubr.msk.f32.mxu1 %vm589_vm7, %v563_v23 }
 0x1d6   : > { %v1576_v57 = vpop.f32.mrb[3].mxu0  ;;  %1194 = vmatmul.mubr.msk.f32.vlgmr.msra.gmra.mrb[0].mxu1 %vm589_vm7, %v564_v55  ;;  %v566_v59 = vmax.f32 %v1573_v56, 0.0 }
 0x1d7   : > { %v565_v58 = vmax.f32 %v1576_v57, 0.0 }
 0x1d9   : > { %v1581_v60 = vpop.f32.mrb[4].mxu0  ;;  %1196 = vmatprep.mubr.msk.f32.mxu1 %vm589_vm7, %v565_v58 }
 0x1da   : > { %v1584_v61 = vpop.f32.mrb[5].mxu0  ;;  %1197 = vmatmul.mubr.msk.f32.gmra.mrb[2].mxu1 %vm589_vm7, %v566_v59  ;;  %v568_v63 = vmax.f32 %v1581_v60, 0.0 }
 0x1db   : > { %v567_v62 = vmax.f32 %v1584_v61, 0.0 }
 0x1dd   : > { %v1589_v14 = vpop.f32.mrb[6].mxu0  ;;  %1199 = vmatprep.mubr.msk.f32.mxu1 %vm589_vm7, %v567_v62 }
 0x1de   : > { %v1592_v15 = vpop.f32.mrb[7].mxu0  ;;  %1200 = vmatmul.mubr.msk.f32.gmra.mrb[4].mxu1 %vm589_vm7, %v568_v63  ;;  %v570_v17 = vmax.f32 %v1589_v14, 0.0 }
 0x1df   : > { %v569_v16 = vmax.f32 %v1592_v15, 0.0 }
 0x1e1   : > { %v1597_v18 = vpop.f32.mrb[8].mxu0  ;;  %1202 = vmatprep.mubr.msk.f32.mxu1 %vm589_vm7, %v569_v16 }
 0x1e2   : > { %v1600_v19 = vpop.f32.mrb[9].mxu0  ;;  %1203 = vmatmul.mubr.msk.f32.gmra.mrb[6].mxu1 %vm589_vm7, %v570_v17  ;;  %v572_v21 = vmax.f32 %v1597_v18, 0.0 }
 0x1e3   : > { %v571_v20 = vmax.f32 %v1600_v19, 0.0 }
 0x1e5   : > { %v1605_v24 = vpop.f32.mrb[10].mxu0  ;;  %1205 = vmatprep.mubr.msk.f32.mxu1 %vm589_vm7, %v571_v20 }
 0x1e6   : > { %v1608_v25 = vpop.f32.mrb[11].mxu0  ;;  %1206 = vmatmul.mubr.msk.f32.gmra.mrb[8].mxu1 %vm589_vm7, %v572_v21  ;;  %v574_v27 = vmax.f32 %v1605_v24, 0.0 }
 0x1e7   : > { %v573_v26 = vmax.f32 %v1608_v25, 0.0 }
 0x1e9   : > { %v1613_v28 = vpop.f32.mrb[12].mxu0  ;;  %1208 = vmatprep.mubr.msk.f32.mxu1 %vm589_vm7, %v573_v26 }
 0x1ea   : > { %v1616_v29 = vpop.f32.mrb[13].mxu0  ;;  %1209 = vmatmul.mubr.msk.f32.gmra.mrb[10].mxu1 %vm589_vm7, %v574_v27  ;;  %v576_v31 = vmax.f32 %v1613_v28, 0.0 }
 0x1eb   : > { %v575_v30 = vmax.f32 %v1616_v29, 0.0 }
 0x1ed   : > { %v1621_v32 = vpop.f32.mrb[14].mxu0  ;;  %1211 = vmatprep.mubr.msk.f32.mxu1 %vm589_vm7, %v575_v30 }
 0x1ee   : > { %v1624_v33 = vpop.f32.mrb[15].mxu0  ;;  %1212 = vmatmul.mubr.msk.f32.gmra.mrb[12].mxu1 %vm589_vm7, %v576_v31  ;;  %v578_v35 = vmax.f32 %v1621_v32, 0.0 }
 0x1ef   : > { %v577_v34 = vmax.f32 %v1624_v33, 0.0 }
 0x1f1   : > { %1214 = vmatprep.mubr.msk.f32.mxu1 %vm589_vm7, %v577_v34 }
 0x1f2   : > { %1215 = vmatmul.mubr.msk.f32.gmra.mrb[14].mxu1 %vm589_vm7, %v578_v35 }
 0x2a9   : > { %v1631_v36 = vpop.f32.mrb[0].mxu1 }
 0x2aa   : > { %805 = vrot.lane.b32.xlu1 %v1631_v36, %s1293_s21  ;;  %v1635_v37 = vpop.f32.mrb[1].mxu1 }
 0x2ab   : > { %803 = vrot.lane.b32.xlu0 %v1635_v37, %s1293_s21 }
 0x2ad   : > { %v1639_v38 = vpop.f32.mrb[2].mxu1 }
 0x2ae   : > { %809 = vrot.lane.b32.xlu1 %v1639_v38, %s1293_s21  ;;  %v1643_v39 = vpop.f32.mrb[3].mxu1 }
 0x2af   : > { %807 = vrot.lane.b32.xlu0 %v1643_v39, %s1293_s21 }
 0x2b1   : > { %v1647_v40 = vpop.f32.mrb[4].mxu1 }
 0x2b2   : > { %813 = vrot.lane.b32.xlu1 %v1647_v40, %s1293_s21  ;;  %v1651_v41 = vpop.f32.mrb[5].mxu1 }
 0x2b3   : > { %811 = vrot.lane.b32.xlu0 %v1651_v41, %s1293_s21 }
 0x2b5   : > { %v1655_v0 = vpop.f32.mrb[6].mxu1 }
 0x2b6   : > { %817 = vrot.lane.b32.xlu1 %v1655_v0, %s1293_s21  ;;  %v1659_v2 = vpop.f32.mrb[7].mxu1 }
 0x2b7   : > { %815 = vrot.lane.b32.xlu0 %v1659_v2, %s1293_s21 }
 0x2b9   : > { %v1663_v42 = vpop.f32.mrb[8].mxu1 }
 0x2ba   : > { %821 = vrot.lane.b32.xlu1 %v1663_v42, %s1293_s21  ;;  %v1667_v1 = vpop.f32.mrb[9].mxu1 }
 0x2bb   : > { %819 = vrot.lane.b32.xlu0 %v1667_v1, %s1293_s21 }
 0x2bd   : > { %v1671_v43 = vpop.f32.mrb[10].mxu1 }
 0x2be   : > { %825 = vrot.lane.b32.xlu1 %v1671_v43, %s1293_s21  ;;  %v1675_v3 = vpop.f32.mrb[11].mxu1 }
 0x2bf   : > { %823 = vrot.lane.b32.xlu0 %v1675_v3, %s1293_s21 }
 0x2c1   : > { %v1679_v44 = vpop.f32.mrb[12].mxu1 }
 0x2c2   : > { %829 = vrot.lane.b32.xlu1 %v1679_v44, %s1293_s21  ;;  %v1683_v4 = vpop.f32.mrb[13].mxu1 }
 0x2c3   : > { %827 = vrot.lane.b32.xlu0 %v1683_v4, %s1293_s21 }
 0x2c5   : > { %v1687_v45 = vpop.f32.mrb[14].mxu1 }
 0x2c6   : > { %833 = vrot.lane.b32.xlu1 %v1687_v45, %s1293_s21  ;;  %v1691_v5 = vpop.f32.mrb[15].mxu1 }
 0x2c7   : > { %831 = vrot.lane.b32.xlu0 %v1691_v5, %s1293_s21 }
 0x31c   : > { %v806_v46 = vpop.permute.xlu1 %805 }
 0x31d   : > { %v852_v6 = vmul.f32 %v1567_v53, %v806_v46  ;;  %v804_v47 = vpop.permute.xlu0 %803 }
 0x31e   : > { %v851_v7 = vmul.f32 %v804_v47, %v1569_v54 }
 0x31f   : > { %885 = vrot.lane.b32.xlu1 %v852_v6, %s1294_s22 }
 0x320   : > { %v810_v48 = vpop.permute.xlu1 %809  ;;  %883 = vrot.lane.b32.xlu0 %v851_v7, %s1294_s22 }
 0x321   : > { %v854_v8 = vmul.f32 %v1573_v56, %v810_v48  ;;  %v808_v49 = vpop.permute.xlu0 %807 }
 0x322   : > { %v853_v9 = vmul.f32 %v808_v49, %v1576_v57 }
 0x323   : > { %889 = vrot.lane.b32.xlu1 %v854_v8, %s1294_s22 }
 0x324   : > { %v814_v50 = vpop.permute.xlu1 %813  ;;  %887 = vrot.lane.b32.xlu0 %v853_v9, %s1294_s22 }
 0x325   : > { %v856_v10 = vmul.f32 %v1581_v60, %v814_v50  ;;  %v812_v51 = vpop.permute.xlu0 %811 }
 0x326   : > { %v855_v11 = vmul.f32 %v812_v51, %v1584_v61 }
 0x327   : > { %893 = vrot.lane.b32.xlu1 %v856_v10, %s1294_s22 }
 0x328   : > { %v818_v12 = vpop.permute.xlu1 %817  ;;  %891 = vrot.lane.b32.xlu0 %v855_v11, %s1294_s22 }
 0x329   : > { %v858_v52 = vmul.f32 %v1589_v14, %v818_v12  ;;  %v816_v13 = vpop.permute.xlu0 %815 }
 0x32a   : > { %v857_v22 = vmul.f32 %v816_v13, %v1592_v15 }
 0x32b   : > { %897 = vrot.lane.b32.xlu1 %v858_v52, %s1294_s22 }
 0x32c   : > { %v822_v53 = vpop.permute.xlu1 %821  ;;  %895 = vrot.lane.b32.xlu0 %v857_v22, %s1294_s22 }
 0x32d   : > { %v860_v54 = vmul.f32 %v1597_v18, %v822_v53  ;;  %v820_v23 = vpop.permute.xlu0 %819 }
 0x32e   : > { %v859_v55 = vmul.f32 %v820_v23, %v1600_v19 }
 0x32f   : > { %901 = vrot.lane.b32.xlu1 %v860_v54, %s1294_s22 }
 0x330   : > { %v826_v56 = vpop.permute.xlu1 %825  ;;  %899 = vrot.lane.b32.xlu0 %v859_v55, %s1294_s22 }
 0x331   : > { %v862_v57 = vmul.f32 %v1605_v24, %v826_v56  ;;  %v824_v58 = vpop.permute.xlu0 %823 }
 0x332   : > { %v861_v59 = vmul.f32 %v824_v58, %v1608_v25 }
 0x333   : > { %905 = vrot.lane.b32.xlu1 %v862_v57, %s1294_s22 }
 0x334   : > { %v830_v60 = vpop.permute.xlu1 %829  ;;  %903 = vrot.lane.b32.xlu0 %v861_v59, %s1294_s22 }
 0x335   : > { %v864_v61 = vmul.f32 %v1613_v28, %v830_v60  ;;  %v828_v62 = vpop.permute.xlu0 %827 }
 0x336   : > { %v863_v63 = vmul.f32 %v828_v62, %v1616_v29 }
 0x337   : > { %909 = vrot.lane.b32.xlu1 %v864_v61, %s1294_s22 }
 0x338   : > { %v834_v14 = vpop.permute.xlu1 %833  ;;  %907 = vrot.lane.b32.xlu0 %v863_v63, %s1294_s22 }
 0x339   : > { %v866_v15 = vmul.f32 %v1621_v32, %v834_v14  ;;  %v832_v16 = vpop.permute.xlu0 %831 }
 0x33a   : > { %v865_v17 = vmul.f32 %v832_v16, %v1624_v33 }
 0x33b   : > { %913 = vrot.lane.b32.xlu1 %v866_v15, %s1294_s22 }
 0x33c   : > { %911 = vrot.lane.b32.xlu0 %v865_v17, %s1294_s22 }
 0x391   : > { %v886_v18 = vpop.permute.xlu1 %885 }
 0x392   : > { %v932_v19 = vadd.f32 %v1631_v36, %v886_v18  ;;  %v884_v20 = vpop.permute.xlu0 %883 }
 0x393   : > { %v931_v21 = vadd.f32 %v884_v20, %v1635_v37 }
 0x394   : > { %949 = vst.msk [vmem:[%s1732_s25 + $0x8] sm:$0xff] %vm947_vm8, %v932_v19 }
 0x395   : > { %948 = vst.msk [vmem:[%s1732_s25] sm:$0xff] %vm947_vm8, %v931_v21  ;;  %v890_v24 = vpop.permute.xlu1 %889 }
 0x396   : > { %v934_v25 = vadd.f32 %v1639_v38, %v890_v24  ;;  %v888_v26 = vpop.permute.xlu0 %887 }
 0x397   : > { %v933_v27 = vadd.f32 %v888_v26, %v1643_v39 }
 0x398   : > { %951 = vst.msk [vmem:[%s1732_s25 + $0x18] sm:$0xff] %vm947_vm8, %v934_v25 }
 0x399   : > { %950 = vst.msk [vmem:[%s1732_s25 + $0x10] sm:$0xff] %vm947_vm8, %v933_v27  ;;  %v894_v28 = vpop.permute.xlu1 %893 }
 0x39a   : > { %v936_v29 = vadd.f32 %v1647_v40, %v894_v28  ;;  %v892_v30 = vpop.permute.xlu0 %891 }
 0x39b   : > { %v935_v31 = vadd.f32 %v892_v30, %v1651_v41 }
 0x39c   : > { %953 = vst.msk [vmem:[%s1732_s25 + $0x28] sm:$0xff] %vm947_vm8, %v936_v29 }
 0x39d   : > { %952 = vst.msk [vmem:[%s1732_s25 + $0x20] sm:$0xff] %vm947_vm8, %v935_v31  ;;  %v898_v32 = vpop.permute.xlu1 %897 }
 0x39e   : > { %v938_v33 = vadd.f32 %v1655_v0, %v898_v32  ;;  %v896_v34 = vpop.permute.xlu0 %895 }
 0x39f   : > { %v937_v35 = vadd.f32 %v896_v34, %v1659_v2 }
 0x3a0   : > { %955 = vst.msk [vmem:[%s1732_s25 + $0x38] sm:$0xff] %vm947_vm8, %v938_v33 }
 0x3a1   : > { %954 = vst.msk [vmem:[%s1732_s25 + $0x30] sm:$0xff] %vm947_vm8, %v937_v35  ;;  %v902_v36 = vpop.permute.xlu1 %901 }
 0x3a2   : > { %v940_v37 = vadd.f32 %v1663_v42, %v902_v36  ;;  %v900_v38 = vpop.permute.xlu0 %899 }
 0x3a3   : > { %v939_v39 = vadd.f32 %v900_v38, %v1667_v1 }
 0x3a4   : > { %957 = vst.msk [vmem:[%s1732_s25 + $0x48] sm:$0xff] %vm947_vm8, %v940_v37 }
 0x3a5   : > { %956 = vst.msk [vmem:[%s1732_s25 + $0x40] sm:$0xff] %vm947_vm8, %v939_v39  ;;  %v906_v40 = vpop.permute.xlu1 %905 }
 0x3a6   : > { %v942_v41 = vadd.f32 %v1671_v43, %v906_v40  ;;  %v904_v0 = vpop.permute.xlu0 %903 }
 0x3a7   : > { %v941_v2 = vadd.f32 %v904_v0, %v1675_v3 }
 0x3a8   : > { %959 = vst.msk [vmem:[%s1732_s25 + $0x58] sm:$0xff] %vm947_vm8, %v942_v41 }
 0x3a9   : > { %958 = vst.msk [vmem:[%s1732_s25 + $0x50] sm:$0xff] %vm947_vm8, %v941_v2  ;;  %v910_v42 = vpop.permute.xlu1 %909 }
 0x3aa   : > { %v944_v46 = vadd.f32 %v1679_v44, %v910_v42  ;;  %v908_v1 = vpop.permute.xlu0 %907 }
 0x3ab   : > { %v943_v6 = vadd.f32 %v908_v1, %v1683_v4 }
 0x3ac   : > { %961 = vst.msk [vmem:[%s1732_s25 + $0x68] sm:$0xff] %vm947_vm8, %v944_v46 }
 0x3ad   : > { %960 = vst.msk [vmem:[%s1732_s25 + $0x60] sm:$0xff] %vm947_vm8, %v943_v6  ;;  %v914_v47 = vpop.permute.xlu1 %913 }
 0x3ae   : > { %v946_v43 = vadd.f32 %v1687_v45, %v914_v47  ;;  %v912_v7 = vpop.permute.xlu0 %911 }
 0x3af   : > { %v945_v3 = vadd.f32 %v912_v7, %v1691_v5 }
 0x3b0   : > { %963 = vst.msk [vmem:[%s1732_s25 + $0x78] sm:$0xff] %vm947_vm8, %v946_v43 }
 0x3b1   : > { %962 = vst.msk [vmem:[%s1732_s25 + $0x70] sm:$0xff] %vm947_vm8, %v945_v3 }
 0x3b2 PF: > { %s13_s12 = sadd.s32 1, %s1288_s12  }
 0x3b3   : > { %p10_p4 = scmp.ge.s32.totalorder %s13_s12, 6  }
 0x3b5   :  { %12 = sbr.rel (!%p10_p4) target bundleno = 1 (0x1), region = 62 }

</bundles_post_ra>
